<compile_context>
chip_gen: v7x
topology: tpu7x:2x2x1
jax: 0.10.0
libtpu: 0.0.40
codegen_flags: <defaults>
</compile_context>

<pallas_src>
import functools

import numpy as np
import jax
import jax.numpy as jnp
from jax import lax
from jax.experimental import pallas as pl
from jax.experimental.pallas import tpu as pltpu

_LANE = 128
_SUBLANE = 8
_HALF_LOG_2PI = 0.5 * float(np.log(2.0 * np.pi))


def _round_up(x: int, m: int) -> int:
    return ((x + m - 1) // m) * m


def _gauss_nll_kernel(mean_ref, std_ref, tgt_ref, out_ref, *, n_valid, block_rows):
    """One row-block: per-(sublane, lane) partial sums of the Gaussian NLL."""
    pid = pl.program_id(0)

    mean = mean_ref[...]                      # [block_rows, 128] f32
    std = std_ref[...]
    tgt = tgt_ref[...]

    diff = mean - tgt
    term = _HALF_LOG_2PI + 0.5 * jnp.log(std) + (diff * diff) / (2.0 * std)

    # Mask out padded elements (global flat index >= n_valid).
    rows = lax.broadcasted_iota(jnp.int32, term.shape, 0)
    lanes = lax.broadcasted_iota(jnp.int32, term.shape, 1)
    flat = (pid * block_rows + rows) * _LANE + lanes
    term = jnp.where(flat < n_valid, term, 0.0)

    # Reduce the block along the row direction down to an (8,128) tile
    # (sublane-group adds only; cheap VPU work, lane-dense output store).
    partial = jnp.sum(term.reshape(block_rows // _SUBLANE, _SUBLANE, _LANE), axis=0)
    out_ref[0] = partial                      # out_ref: [1, 8, 128]


def gauss_dis_loss(mean_scores, std_scores, targets, *, max_block_rows=512):
    """Gaussian-distribution regression loss (mean of per-element NLL)."""
    mean = jnp.ravel(mean_scores).astype(jnp.float32)
    std = jnp.ravel(std_scores).astype(jnp.float32)
    tgt = jnp.ravel(targets).astype(jnp.float32)
    n = int(mean.shape[0])
    assert std.shape[0] == n and tgt.shape[0] == n

    # Lane-dense layout: [rows_pad, 128] with rows_pad a multiple of the block.
    rows = (n + _LANE - 1) // _LANE
    block_rows = min(_round_up(max_block_rows, _SUBLANE), _round_up(rows, _SUBLANE))
    rows_pad = _round_up(max(rows, 1), block_rows)
    n_pad = rows_pad * _LANE
    pad = n_pad - n

    mean2 = jnp.pad(mean, (0, pad)).reshape(rows_pad, _LANE)
    tgt2 = jnp.pad(tgt, (0, pad)).reshape(rows_pad, _LANE)
    # std padded with 1.0 -> log/divide finite even before the in-kernel mask.
    std2 = jnp.pad(std, (0, pad), constant_values=1.0).reshape(rows_pad, _LANE)

    grid = rows_pad // block_rows
    kernel = functools.partial(_gauss_nll_kernel, n_valid=n, block_rows=block_rows)

    partials = pl.pallas_call(
        kernel,
        out_shape=jax.ShapeDtypeStruct((grid, _SUBLANE, _LANE), jnp.float32),
        grid=(grid,),
        in_specs=[pl.BlockSpec((block_rows, _LANE), lambda i: (i, 0)) for _ in range(3)],
        out_specs=pl.BlockSpec((1, _SUBLANE, _LANE), lambda i: (i, 0, 0)),
        compiler_params=pltpu.CompilerParams(
            dimension_semantics=("parallel",),
            vmem_limit_bytes=32 * 1024 * 1024,
        ),
        cost_estimate=pl.CostEstimate(
            flops=8 * n_pad,
            transcendentals=n_pad,
            bytes_accessed=3 * 4 * n_pad + 4 * grid * _SUBLANE * _LANE,
        ),
    )(mean2, std2, tgt2)

    # Tiny final reduction + normalization in plain JAX (few KiB at most).
    return jnp.sum(partials) / jnp.float32(n)


def _gauss_dis_loss_ref(mean_scores, std_scores, targets):
    """Pure-JAX reference mirroring the torch code."""
    mean = jnp.ravel(mean_scores).astype(jnp.float32)
    std = jnp.ravel(std_scores).astype(jnp.float32)
    tgt = jnp.ravel(targets).astype(jnp.float32)
    mse = (0.5 * jnp.log(2.0 * jnp.float32(np.pi))
           + 0.5 * jnp.log(std)
           + (mean - tgt) ** 2 / (2.0 * std))
    return jnp.mean(mse)


# TODO(synk): the torch `gpu: int` argument only does device placement
# (torch.cuda.set_device); device placement is handled by JAX, not in-kernel.

if __name__ == "__main__":
    key = jax.random.PRNGKey(0)
    k1, k2, k3 = jax.random.split(key, 3)

    # Small shapes consistent with the module: per-example scalar mean/std/target.
    n = 200
    mean_scores = jax.random.normal(k1, (n, 1), dtype=jnp.float32)
    std_scores = jax.random.uniform(k2, (n, 1), dtype=jnp.float32, minval=0.1, maxval=2.0)
    targets = jax.random.normal(k3, (n, 1), dtype=jnp.float32)

    loss = gauss_dis_loss(mean_scores, std_scores, targets)
    jax.block_until_ready(loss)
    ref = _gauss_dis_loss_ref(mean_scores, std_scores, targets)
    np.testing.assert_allclose(np.asarray(loss), np.asarray(ref), rtol=1e-5, atol=1e-5)

    # Second case: force several grid steps (exercises the pipelined/parallel path).
    n2 = 5000
    m2 = jax.random.normal(k1, (n2,), dtype=jnp.float32)
    s2 = jax.random.uniform(k2, (n2,), dtype=jnp.float32, minval=0.05, maxval=3.0)
    t2 = jax.random.normal(k3, (n2,), dtype=jnp.float32)
    loss2 = gauss_dis_loss(m2, s2, t2, max_block_rows=8)
    jax.block_until_ready(loss2)
    ref2 = _gauss_dis_loss_ref(m2, s2, t2)
    np.testing.assert_allclose(np.asarray(loss2), np.asarray(ref2), rtol=1e-5, atol=1e-5)

    print("KERNEL_OK")
</pallas_src>

<mosaic_0001>
module attributes {stable_mosaic.version = 11 : i64} {
  func.func @_gauss_nll_kernel(%arg0: i32, %arg1: memref<8x128xf32, #tpu.memory_space<vmem>>, %arg2: memref<8x128xf32, #tpu.memory_space<vmem>>, %arg3: memref<8x128xf32, #tpu.memory_space<vmem>>, %arg4: memref<1x8x128xf32, #tpu.memory_space<vmem>>) attributes {dimension_semantics = [#tpu.dimension_semantics<parallel>], iteration_bounds = array<i64: 1>, scalar_prefetch = 0 : i64, scratch_operands = 0 : i64, tpu.core_type = #tpu.core_type<tc>, window_params = [{transform_indices = @transform_0, window_bounds = array<i64: 8, 128>}, {transform_indices = @transform_1, window_bounds = array<i64: 8, 128>}, {transform_indices = @transform_2, window_bounds = array<i64: 8, 128>}, {transform_indices = @transform_3, window_bounds = array<i64: 1, 8, 128>}]} {
    %c0 = arith.constant 0 : index
    %c0_0 = arith.constant 0 : index
    %0 = vector.load %arg1[%c0, %c0_0] : memref<8x128xf32, #tpu.memory_space<vmem>>, vector<8x128xf32>
    %c0_1 = arith.constant 0 : index
    %c0_2 = arith.constant 0 : index
    %1 = vector.load %arg2[%c0_1, %c0_2] : memref<8x128xf32, #tpu.memory_space<vmem>>, vector<8x128xf32>
    %c0_3 = arith.constant 0 : index
    %c0_4 = arith.constant 0 : index
    %2 = vector.load %arg3[%c0_3, %c0_4] : memref<8x128xf32, #tpu.memory_space<vmem>>, vector<8x128xf32>
    %3 = arith.subf %0, %2 : vector<8x128xf32>
    %4 = math.log %1 : vector<8x128xf32>
    %cst = arith.constant 5.000000e-01 : f32
    %5 = vector.broadcast %cst : f32 to vector<8x128xf32>
    %6 = arith.mulf %5, %4 : vector<8x128xf32>
    %cst_5 = arith.constant 0.918938517 : f32
    %7 = vector.broadcast %cst_5 : f32 to vector<8x128xf32>
    %8 = arith.addf %7, %6 : vector<8x128xf32>
    %9 = arith.mulf %3, %3 : vector<8x128xf32>
    %cst_6 = arith.constant 2.000000e+00 : f32
    %10 = vector.broadcast %cst_6 : f32 to vector<8x128xf32>
    %11 = arith.mulf %10, %1 : vector<8x128xf32>
    %12 = arith.divf %9, %11 : vector<8x128xf32>
    %13 = arith.addf %8, %12 : vector<8x128xf32>
    %14 = tpu.iota {dimensions = array<i32: 0>} : vector<8x128xi32>
    %15 = tpu.iota {dimensions = array<i32: 1>} : vector<8x128xi32>
    %c8_i32 = arith.constant 8 : i32
    %16 = arith.muli %arg0, %c8_i32 : i32
    %17 = vector.broadcast %16 : i32 to vector<8x128xi32>
    %18 = arith.addi %17, %14 : vector<8x128xi32>
    %c128_i32 = arith.constant 128 : i32
    %19 = vector.broadcast %c128_i32 : i32 to vector<8x128xi32>
    %20 = arith.muli %18, %19 : vector<8x128xi32>
    %21 = arith.addi %20, %15 : vector<8x128xi32>
    %c200_i32 = arith.constant 200 : i32
    %22 = vector.broadcast %c200_i32 : i32 to vector<8x128xi32>
    %23 = arith.cmpi slt, %21, %22 : vector<8x128xi32>
    %cst_7 = arith.constant 0.000000e+00 : f32
    %24 = vector.broadcast %cst_7 : f32 to vector<8x128xf32>
    %25 = arith.select %23, %13, %24 : vector<8x128xi1>, vector<8x128xf32>
    %26 = vector.shape_cast %25 : vector<8x128xf32> to vector<1x8x128xf32>
    %cst_8 = arith.constant dense<0.000000e+00> : vector<8x128xf32>
    %27 = vector.multi_reduction <add>, %26, %cst_8 [0] : vector<1x8x128xf32> to vector<8x128xf32>
    %c0_9 = arith.constant 0 : index
    %c0_10 = arith.constant 0 : index
    %c0_11 = arith.constant 0 : index
    %28 = vector.load %arg4[%c0_9, %c0_10, %c0_11] : memref<1x8x128xf32, #tpu.memory_space<vmem>>, vector<1x8x128xf32>
    %29 = vector.shape_cast %28 : vector<1x8x128xf32> to vector<8x128xf32>
    %30 = vector.shape_cast %27 : vector<8x128xf32> to vector<1x8x128xf32>
    tpu.vector_store %arg4[%c0_9, %c0_10, %c0_11], %30 {strides = array<i32>} : memref<1x8x128xf32, #tpu.memory_space<vmem>>, vector<1x8x128xf32>,
    return
  }
  func.func @transform_0(%arg0: i32) -> (i32, i32) {
    %c0_i32 = arith.constant 0 : i32
    %c0_i32_0 = arith.constant 0 : i32
    return %arg0, %c0_i32 : i32, i32
  }
  func.func @transform_1(%arg0: i32) -> (i32, i32) {
    %c0_i32 = arith.constant 0 : i32
    %c0_i32_0 = arith.constant 0 : i32
    return %arg0, %c0_i32 : i32, i32
  }
  func.func @transform_2(%arg0: i32) -> (i32, i32) {
    %c0_i32 = arith.constant 0 : i32
    %c0_i32_0 = arith.constant 0 : i32
    return %arg0, %c0_i32 : i32, i32
  }
  func.func @transform_3(%arg0: i32) -> (i32, i32, i32) {
    %c0_i32 = arith.constant 0 : i32
    %c0_i32_0 = arith.constant 0 : i32
    %c0_i32_1 = arith.constant 0 : i32
    return %arg0, %c0_i32, %c0_i32_0 : i32, i32, i32
  }
}

</mosaic_0001>

<bundles_post_ra>
// kernel: tpu_custom_call.1
= control target key start
LH: loop header
LB: loop body
LE: loop exit
PB: predicated region body
PF: predicated region fallthrough
CT: control target
= control target key end

     0   :  { %8 = vsyncpa [#allocation3], 0  ;;  %s266_s0 = inlined_call_operand.hbm [shape: f32[8,128], index: 0, kind: input, shape index: {}]   ;;  %s267_s1 = inlined_call_operand.hbm [shape: f32[8,128], index: 1, kind: input, shape index: {}]   ;;  %s268_s2 = inlined_call_operand.hbm [shape: f32[8,128], index: 2, kind: input, shape index: {}]   ;;  %s269_s3 = inlined_call_operand.hbm [shape: f32[1,8,128], index: 3, kind: output, shape index: {}]  }
   0x1   :  { %9 = vsyncpa [#allocation6], 0 }
   0x2   :  { %10 = vsyncpa [#allocation4], 0  ;;  %s194_s12 = smov [#allocation5]   ;;  %s195_s14 = smov [#allocation2]  }
   0x3   :  { %s27_s13 = sshll.u32 %s194_s12, 4  ;;  %s17_s15 = sshll.u32 %s195_s14, 4  ;;  %s28_s13 = int_to_ptr.vmem [resolvable:$true] %s27_s13  ;;  %s18_s15 = int_to_ptr.vmem [resolvable:$true] %s17_s15 }
   0x4   :  { %s100_s18 = scalar_lea.hbm %s267_s1, 128 }
   0x5   :  { %p101_p0 = scmp.ne.s32.totalorder %s267_s1, %s100_s18  ;;  %p104_p1 = scmp.lt.u32.totalorder %s100_s18, %s267_s1 }
   0x7   :  { %p106_p2 = pnand %p104_p1, %p101_p0 }
   0x9   :  { %109 = shalt.err (!%p106_p2)
}
   0xa   :  { %s110_s23 = scalar_lea.vmem %s28_s13, 128  ;;  %p115_p4 = scmp.lt.s32.totalorder %s28_s13, %s28_s13 }
   0xb   :  { %p111_p3 = scmp.ne.s32.totalorder %s28_s13, %s110_s23  ;;  %p116_p5 = scmp.lt.s32.totalorder %s110_s23, %s110_s23 }
   0xd   :  { %p117_p6 = por %p116_p5, %p115_p4 }
   0xf   :  { %p118_p7 = pnand %p117_p6, %p111_p3 }
  0x11   :  { %121 = shalt.err (!%p118_p7)
}
  0x12   :  { %30 = dma.hbm_to_vmem [thread:$0]  %s267_s1, 128, %s28_s13, [#allocation6]  }
  0x13   :  { %s122_s28 = scalar_lea.hbm %s266_s0, 128 }
  0x14   :  { %p123_p8 = scmp.ne.s32.totalorder %s266_s0, %s122_s28  ;;  %p126_p9 = scmp.lt.u32.totalorder %s122_s28, %s266_s0 }
  0x16   :  { %p128_p10 = pnand %p126_p9, %p123_p8 }
  0x18   :  { %131 = shalt.err (!%p128_p10)
}
  0x19   :  { %s132_s6 = scalar_lea.vmem %s18_s15, 128  ;;  %p137_p12 = scmp.lt.s32.totalorder %s18_s15, %s18_s15 }
  0x1a   :  { %p133_p11 = scmp.ne.s32.totalorder %s18_s15, %s132_s6  ;;  %p138_p13 = scmp.lt.s32.totalorder %s132_s6, %s132_s6 }
  0x1c   :  { %p139_p0 = por %p138_p13, %p137_p12 }
  0x1e   :  { %p140_p1 = pnand %p139_p0, %p133_p11 }
  0x20   :  { %143 = shalt.err (!%p140_p1)
}
  0x21   :  { %20 = dma.hbm_to_vmem [thread:$0]  %s266_s0, 128, %s18_s15, [#allocation3]  }
  0x22   :  { %s196_s8 = smov [#allocation7]   ;;  %s144_s12 = scalar_lea.hbm %s268_s2, 128 }
  0x23   :  { %s37_s9 = sshll.u32 %s196_s8, 4  ;;  %p145_p2 = scmp.ne.s32.totalorder %s268_s2, %s144_s12  ;;  %s38_s9 = int_to_ptr.vmem [resolvable:$true] %s37_s9 }
  0x24   :  { %p148_p3 = scmp.lt.u32.totalorder %s144_s12, %s268_s2 }
  0x26   :  { %p150_p4 = pnand %p148_p3, %p145_p2 }
  0x28   :  { %153 = shalt.err (!%p150_p4)
}
  0x29   :  { %s154_s18 = scalar_lea.vmem %s38_s9, 128  ;;  %p159_p6 = scmp.lt.s32.totalorder %s38_s9, %s38_s9 }
  0x2a   :  { %p155_p5 = scmp.ne.s32.totalorder %s38_s9, %s154_s18  ;;  %p160_p7 = scmp.lt.s32.totalorder %s154_s18, %s154_s18 }
  0x2c   :  { %p161_p8 = por %p160_p7, %p159_p6 }
  0x2e   :  { %p162_p9 = pnand %p161_p8, %p155_p5 }
  0x30   :  { %165 = shalt.err (!%p162_p9)
}
  0x31   :  { %40 = dma.hbm_to_vmem [thread:$0]  %s268_s2, 128, %s38_s9, [#allocation6]  }
  0x32   :  { %188 = dma.done.wait [#allocation3], 128  }
  0x33   :  { %189 = vsyncadd [#allocation3], 4294967168 }
  0x34   :  { %190 = dma.done.wait [#allocation6], 256  }
  0x35   :  { %191 = vsyncadd [#allocation6], 4294967040  ;;  %v51_v0 = vld [vmem:[#allocation5] sm:$0xff]  ;;  %v63_v2 = vlaneseq  ;;  %v50_v3 = vld [vmem:[#allocation2] sm:$0xff]  ;;  %s197_s2 = smov [#allocation8]  }
  0x36   :  { %96 = vlog2.f32 %v51_v0  ;;  %v59_v1 = vmul.f32 2.0, %v51_v0  ;;  %v52_v4 = vld [vmem:[#allocation7] sm:$0xff]  ;;  %s82_s19 = sshll.u32 %s197_s2, 4  ;;  %s83_s19 = int_to_ptr.vmem [resolvable:$true] %s82_s19 }
  0x37   :  { %v64_v5 = vshrl.u32 %v63_v2, 7  ;;  %v53_v6 = vsub.f32 %v50_v3, %v52_v4  ;;  %v66_v7 = vand.u32 127, %v63_v2  ;;  %s166_s20 = scalar_lea.vmem %s83_s19, 128  ;;  %p171_p11 = scmp.lt.s32.totalorder %s83_s19, %s83_s19 }
  0x38   :  { %98 = vrcp.f32 %v59_v1  ;;  %p167_p10 = scmp.ne.s32.totalorder %s83_s19, %s166_s20  ;;  %p172_p12 = scmp.lt.s32.totalorder %s166_s20, %s166_s20 }
  0x39   :  { %v70_v8 = vmul.u32 128, %v64_v5  ;;  %v58_v9 = vmul.f32 %v53_v6, %v53_v6 }
  0x3a   :  { %p173_p13 = por %p172_p12, %p171_p11 }
  0x3b   :  { %v71_v13 = vadd.s32 %v70_v8, %v66_v7 }
  0x3c   :  { %p174_p0 = pnand %p173_p13, %p167_p10 }
  0x3d   :  { %vm72_vm0 = vcmp.lt.s32.totalorder %v71_v13, 200 }
  0x40   :  { %v97_v10 = vpop.eup %96 }
  0x41   :  { %v55_v11 = vmul.f32 0.6931472, %v97_v10 }
  0x42   :  { %v99_v12 = vpop.eup %98 }
  0x43   :  { %v56_v14 = vmul.f32 0.5, %v55_v11  ;;  %v61_v15 = vmul.f32 %v99_v12, %v58_v9 }
  0x45   :  { %v57_v16 = vadd.f32 0.9189385, %v56_v14 }
  0x47   :  { %v62_v17 = vadd.f32 %v61_v15, %v57_v16 }
  0x49   :  { %v73_v18 = vsel %vm72_vm0, %v62_v17, 0.0 }
  0x4a   :  { %75 = vst [vmem:[#allocation8] sm:$0xff] %v73_v18 }
  0x4b   :  { %177 = shalt.err (!%p174_p0)
}
  0x4c   :  { %s178_s23 = scalar_lea.hbm %s269_s3, 128 }
  0x4d   :  { %p179_p1 = scmp.ne.s32.totalorder %s269_s3, %s178_s23  ;;  %p182_p2 = scmp.lt.u32.totalorder %s178_s23, %s269_s3 }
  0x4f   :  { %p184_p3 = pnand %p182_p2, %p179_p1 }
  0x51   :  { %187 = shalt.err (!%p184_p3)
}
  0x52   :  { %85 = dma.vmem_to_hbm [thread:$0]  %s83_s19, 128, %s269_s3, [#allocation4]  }
  0x53   :  { %192 = dma.done.wait [#allocation4], 128  }
  0x54   :  { %193 = vsyncadd [#allocation4], 4294967168 }
  0x55   :  { %89 = vsyncpa [#allocation3], 1 }
  0x56   :  { %90 = vsyncpa [#allocation6], 1 }
  0x57   :  { %91 = vsyncpa [#allocation4], 1 }

</bundles_post_ra>
